<compile_context>
chip_gen: v7x
topology: tpu7x:2x2x1
jax: 0.10.0
libtpu: 0.0.40
codegen_flags: <defaults>
</compile_context>

<pallas_src>
import jax
import jax.numpy as jnp
from jax.experimental import pallas as pl
from jax.experimental.pallas import tpu as pltpu

HIDDEN = 256


def _round_up(v, m):
    return ((v + m - 1) // m) * m


def _leaky_relu(x, slope=0.2):
    return jnp.where(x > 0, x, slope * x)


def fine_tune_kernel(x_ref, w1_ref, wstk_ref, w7_ref, b_ref, out_ref):
    # ----- Encoder: 3 x (Linear -> LeakyReLU(0.2) -> Dropout(p=0.0 == id)) + Linear -----
    h = jnp.dot(x_ref[...], w1_ref[...], preferred_element_type=jnp.float32) + b_ref[0, :]
    h = _leaky_relu(h).astype(jnp.bfloat16)

    h = jnp.dot(h, wstk_ref[0], preferred_element_type=jnp.float32) + b_ref[1, :]
    h = _leaky_relu(h).astype(jnp.bfloat16)

    h = jnp.dot(h, wstk_ref[1], preferred_element_type=jnp.float32) + b_ref[2, :]
    h = _leaky_relu(h).astype(jnp.bfloat16)

    h = jnp.dot(h, wstk_ref[2], preferred_element_type=jnp.float32) + b_ref[3, :]
    h = h.astype(jnp.bfloat16)  # encoder output (no activation)

    # ----- c_head: 2 x (Linear -> ReLU -> Dropout(0.0)) + Linear(256 -> 1) -----
    h = jnp.dot(h, wstk_ref[3], preferred_element_type=jnp.float32) + b_ref[4, :]
    h = jnp.maximum(h, 0.0).astype(jnp.bfloat16)

    h = jnp.dot(h, wstk_ref[4], preferred_element_type=jnp.float32) + b_ref[5, :]
    h = jnp.maximum(h, 0.0)  # stays f32; feeds the f32 VPU tail

    # Final 256 -> 1 layer: VPU multiply + XLU lane reduction (w7 is a (1,256) f32 row).
    out_ref[...] = jnp.sum(h * w7_ref[...], axis=-1, keepdims=True) + b_ref[6, 0:1]


def fine_tune_forward(x, params, *, block_m=1024):
    """x: (B, input_dim) float32.  params: list of 7 (W, b), W (in, out), b (1, out)."""
    B, input_dim = x.shape
    hidden = params[1][0].shape[0]
    assert len(params) == 7 and hidden == HIDDEN

    # ---- pack parameters ----
    w1 = params[0][0].astype(jnp.bfloat16)                                        # (F, 256)
    w_stack = jnp.stack([params[i][0].astype(jnp.bfloat16) for i in range(1, 6)])  # (5,256,256)
    w7_row = params[6][0].reshape(1, -1).astype(jnp.float32)                      # (1, 256)

    b_rows = []
    for (_, b) in params:
        row = jnp.zeros((hidden,), jnp.float32)
        row = row.at[: b.size].set(b.reshape(-1).astype(jnp.float32))
        b_rows.append(row)
    b_rows.append(jnp.zeros((hidden,), jnp.float32))  # pad 7 -> 8 rows (sublane multiple)
    b_stack = jnp.stack(b_rows)                        # (8, 256) f32

    # ---- batch tiling ----
    block_m = _round_up(max(int(block_m), 16), 16)     # don't trust caller's alignment
    tm = min(block_m, _round_up(B, 16))
    # Guarantee >= 2 grid steps whenever there is enough work, so the "parallel"
    # batch axis can shard across both TensorCores on v7x.
    if B > 16 and pl.cdiv(B, tm) < 2:
        tm = _round_up(pl.cdiv(B, 2), 16)
    Bp = pl.cdiv(B, tm) * tm

    xb = x.astype(jnp.bfloat16)                        # bf16 streaming of the only per-step input
    if Bp != B:
        xb = jnp.pad(xb, ((0, Bp - B), (0, 0)))
    grid = (Bp // tm,)

    flops = 2 * Bp * (input_dim * hidden + 5 * hidden * hidden + hidden)
    bytes_accessed = (xb.size * 2 + w1.size * 2 + w_stack.size * 2
                      + w7_row.size * 4 + b_stack.size * 4 + Bp * 4)
    cost = pl.CostEstimate(flops=flops, transcendentals=0, bytes_accessed=bytes_accessed)

    out = pl.pallas_call(
        fine_tune_kernel,
        out_shape=jax.ShapeDtypeStruct((Bp, 1), jnp.float32),
        grid=grid,
        in_specs=[
            # x: tiled along batch.
            pl.BlockSpec((tm, input_dim), lambda i: (i, 0)),
            # Weights / biases: full-array blocks with constant index_maps -> DMA'd
            # once, VMEM-resident across all batch tiles.
            pl.BlockSpec(w1.shape, lambda i: (0, 0)),
            pl.BlockSpec(w_stack.shape, lambda i: (0, 0, 0)),
            pl.BlockSpec(w7_row.shape, lambda i: (0, 0)),
            pl.BlockSpec(b_stack.shape, lambda i: (0, 0)),
        ],
        out_specs=pl.BlockSpec((tm, 1), lambda i: (i, 0)),
        compiler_params=pltpu.CompilerParams(
            dimension_semantics=("parallel",)),  # batch tiles shard across TCs on v7x
        cost_estimate=cost,
    )(xb, w1, w_stack, w7_row, b_stack)
    return out[:B]


def ref_forward(x, params):
    """Pure-JAX reference mirroring the kernel math (bf16 weights/carry, f32 accumulate)."""
    h = x.astype(jnp.bfloat16)
    for i, (w, b) in enumerate(params):
        if i < 6:
            h = jnp.dot(h, w.astype(jnp.bfloat16),
                        preferred_element_type=jnp.float32) + b.astype(jnp.float32)
            if i < 3:
                h = jnp.where(h > 0, h, 0.2 * h).astype(jnp.bfloat16)   # encoder LeakyReLU
            elif i == 3:
                h = h.astype(jnp.bfloat16)                              # encoder output
            elif i == 4:
                h = jnp.maximum(h, 0.0).astype(jnp.bfloat16)            # head ReLU
            else:
                h = jnp.maximum(h, 0.0)                                 # head ReLU, stays f32
        else:
            h = h @ w.astype(jnp.float32) + b.astype(jnp.float32)       # final 256->1 in f32
    return h


def _xavier_uniform(key, fan_in, fan_out):
    limit = (6.0 / (fan_in + fan_out)) ** 0.5
    return jax.random.uniform(key, (fan_in, fan_out), jnp.float32, -limit, limit)


def init_params(key, input_dim, hidden=HIDDEN):
    """Deterministic synthetic init (stands in for the checkpoint load)."""
    # TODO(synk): real module loads 'TabMap/pre_encoder_checkpoint.dict'; synthetic init here.
    enc_dims = [(input_dim, hidden), (hidden, hidden), (hidden, hidden), (hidden, hidden)]
    head_dims = [(hidden, hidden), (hidden, hidden), (hidden, 1)]
    params = []
    for (fi, fo) in enc_dims + head_dims:
        key, kw = jax.random.split(key)
        params.append((_xavier_uniform(kw, fi, fo),
                       jnp.full((1, fo), 0.01, jnp.float32)))  # bias.fill_(0.01)
    return params


if __name__ == "__main__":
    key = jax.random.PRNGKey(0)
    key, kx, kp = jax.random.split(key, 3)

    B, input_dim = 40, 32
    x = jax.random.normal(kx, (B, input_dim), jnp.float32)
    params = init_params(kp, input_dim)

    # Small tile -> multi-step grid + batch-padding path.
    out_small = fine_tune_forward(x, params, block_m=16)
    # Default tile -> exercises the ">= 2 grid steps" cap (tm=32, grid=2 here).
    out_default = fine_tune_forward(x, params)
    jax.block_until_ready((out_small, out_default))

    assert out_small.shape == (B, 1) and out_small.dtype == jnp.float32
    assert out_default.shape == (B, 1)

    ref = ref_forward(x, params)
    assert jnp.allclose(out_small, ref, atol=2e-2, rtol=2e-2)
    assert jnp.allclose(out_default, ref, atol=2e-2, rtol=2e-2)
    assert jnp.allclose(out_small, out_default, atol=1e-4, rtol=1e-4)

    print("KERNEL_OK")
</pallas_src>

<mosaic_0001>
module attributes {stable_mosaic.version = 11 : i64} {
  func.func @fine_tune_kernel(%arg0: i32, %arg1: memref<16x32xbf16, #tpu.memory_space<vmem>>, %arg2: memref<32x256xbf16, #tpu.memory_space<vmem>>, %arg3: memref<5x256x256xbf16, #tpu.memory_space<vmem>>, %arg4: memref<1x256xf32, #tpu.memory_space<vmem>>, %arg5: memref<8x256xf32, #tpu.memory_space<vmem>>, %arg6: memref<16x1xf32, #tpu.memory_space<vmem>>) attributes {dimension_semantics = [#tpu.dimension_semantics<parallel>], iteration_bounds = array<i64: 3>, scalar_prefetch = 0 : i64, scratch_operands = 0 : i64, tpu.core_type = #tpu.core_type<tc>, window_params = [{transform_indices = @transform_0, window_bounds = array<i64: 16, 32>}, {pipeline_mode = #tpu.pipeline_mode<synchronous>, transform_indices = @transform_1, window_bounds = array<i64: 32, 256>}, {pipeline_mode = #tpu.pipeline_mode<synchronous>, transform_indices = @transform_2, window_bounds = array<i64: 5, 256, 256>}, {pipeline_mode = #tpu.pipeline_mode<synchronous>, transform_indices = @transform_3, window_bounds = array<i64: 1, 256>}, {pipeline_mode = #tpu.pipeline_mode<synchronous>, transform_indices = @transform_4, window_bounds = array<i64: 8, 256>}, {transform_indices = @transform_5, window_bounds = array<i64: 16, 1>}]} {
    %c0 = arith.constant 0 : index
    %c0_0 = arith.constant 0 : index
    %0 = vector.load %arg1[%c0, %c0_0] : memref<16x32xbf16, #tpu.memory_space<vmem>>, vector<16x32xbf16>
    %c0_1 = arith.constant 0 : index
    %c0_2 = arith.constant 0 : index
    %1 = vector.load %arg2[%c0_1, %c0_2] : memref<32x256xbf16, #tpu.memory_space<vmem>>, vector<32x256xbf16>
    %cst = arith.constant dense<0.000000e+00> : vector<16x256xf32>
    %2 = tpu.matmul %0, %1, %cst {dimension_numbers = #tpu.dot_dimension_numbers<[1], [0], [0], [1], [0, 0, 1, 1], [], []>} : vector<16x32xbf16>, vector<32x256xbf16>, vector<16x256xf32> -> vector<16x256xf32>
    %c0_3 = arith.constant 0 : index
    %c0_4 = arith.constant 0 : index
    %3 = vector.load %arg5[%c0_3, %c0_4] : memref<8x256xf32, #tpu.memory_space<vmem>>, vector<1x256xf32>
    %4 = vector.shape_cast %3 : vector<1x256xf32> to vector<256xf32>
    %5 = vector.shape_cast %4 : vector<256xf32> to vector<1x256xf32>
    %6 = vector.broadcast %5 : vector<1x256xf32> to vector<16x256xf32>
    %7 = arith.addf %2, %6 : vector<16x256xf32>
    %cst_5 = arith.constant 0.000000e+00 : f32
    %8 = vector.broadcast %cst_5 : f32 to vector<16x256xf32>
    %9 = arith.cmpf ogt, %7, %8 : vector<16x256xf32>
    %cst_6 = arith.constant 2.000000e-01 : f32
    %10 = vector.broadcast %cst_6 : f32 to vector<16x256xf32>
    %11 = arith.mulf %10, %7 : vector<16x256xf32>
    %12 = arith.select %9, %7, %11 : vector<16x256xi1>, vector<16x256xf32>
    %13 = arith.truncf %12 : vector<16x256xf32> to vector<16x256xbf16>
    %c0_7 = arith.constant 0 : index
    %c0_8 = arith.constant 0 : index
    %c0_9 = arith.constant 0 : index
    %14 = vector.load %arg3[%c0_7, %c0_8, %c0_9] : memref<5x256x256xbf16, #tpu.memory_space<vmem>>, vector<1x256x256xbf16>
    %15 = vector.shape_cast %14 : vector<1x256x256xbf16> to vector<256x256xbf16>
    %cst_10 = arith.constant dense<0.000000e+00> : vector<16x256xf32>
    %16 = tpu.matmul %13, %15, %cst_10 {dimension_numbers = #tpu.dot_dimension_numbers<[1], [0], [0], [1], [0, 0, 1, 1], [], []>} : vector<16x256xbf16>, vector<256x256xbf16>, vector<16x256xf32> -> vector<16x256xf32>
    %c1 = arith.constant 1 : index
    %c0_11 = arith.constant 0 : index
    %17 = vector.load %arg5[%c1, %c0_11] : memref<8x256xf32, #tpu.memory_space<vmem>>, vector<1x256xf32>
    %18 = vector.shape_cast %17 : vector<1x256xf32> to vector<256xf32>
    %19 = vector.shape_cast %18 : vector<256xf32> to vector<1x256xf32>
    %20 = vector.broadcast %19 : vector<1x256xf32> to vector<16x256xf32>
    %21 = arith.addf %16, %20 : vector<16x256xf32>
    %cst_12 = arith.constant 0.000000e+00 : f32
    %22 = vector.broadcast %cst_12 : f32 to vector<16x256xf32>
    %23 = arith.cmpf ogt, %21, %22 : vector<16x256xf32>
    %cst_13 = arith.constant 2.000000e-01 : f32
    %24 = vector.broadcast %cst_13 : f32 to vector<16x256xf32>
    %25 = arith.mulf %24, %21 : vector<16x256xf32>
    %26 = arith.select %23, %21, %25 : vector<16x256xi1>, vector<16x256xf32>
    %27 = arith.truncf %26 : vector<16x256xf32> to vector<16x256xbf16>
    %c1_14 = arith.constant 1 : index
    %c0_15 = arith.constant 0 : index
    %c0_16 = arith.constant 0 : index
    %28 = vector.load %arg3[%c1_14, %c0_15, %c0_16] : memref<5x256x256xbf16, #tpu.memory_space<vmem>>, vector<1x256x256xbf16>
    %29 = vector.shape_cast %28 : vector<1x256x256xbf16> to vector<256x256xbf16>
    %cst_17 = arith.constant dense<0.000000e+00> : vector<16x256xf32>
    %30 = tpu.matmul %27, %29, %cst_17 {dimension_numbers = #tpu.dot_dimension_numbers<[1], [0], [0], [1], [0, 0, 1, 1], [], []>} : vector<16x256xbf16>, vector<256x256xbf16>, vector<16x256xf32> -> vector<16x256xf32>
    %c2 = arith.constant 2 : index
    %c0_18 = arith.constant 0 : index
    %31 = vector.load %arg5[%c2, %c0_18] : memref<8x256xf32, #tpu.memory_space<vmem>>, vector<1x256xf32>
    %32 = vector.shape_cast %31 : vector<1x256xf32> to vector<256xf32>
    %33 = vector.shape_cast %32 : vector<256xf32> to vector<1x256xf32>
    %34 = vector.broadcast %33 : vector<1x256xf32> to vector<16x256xf32>
    %35 = arith.addf %30, %34 : vector<16x256xf32>
    %cst_19 = arith.constant 0.000000e+00 : f32
    %36 = vector.broadcast %cst_19 : f32 to vector<16x256xf32>
    %37 = arith.cmpf ogt, %35, %36 : vector<16x256xf32>
    %cst_20 = arith.constant 2.000000e-01 : f32
    %38 = vector.broadcast %cst_20 : f32 to vector<16x256xf32>
    %39 = arith.mulf %38, %35 : vector<16x256xf32>
    %40 = arith.select %37, %35, %39 : vector<16x256xi1>, vector<16x256xf32>
    %41 = arith.truncf %40 : vector<16x256xf32> to vector<16x256xbf16>
    %c2_21 = arith.constant 2 : index
    %c0_22 = arith.constant 0 : index
    %c0_23 = arith.constant 0 : index
    %42 = vector.load %arg3[%c2_21, %c0_22, %c0_23] : memref<5x256x256xbf16, #tpu.memory_space<vmem>>, vector<1x256x256xbf16>
    %43 = vector.shape_cast %42 : vector<1x256x256xbf16> to vector<256x256xbf16>
    %cst_24 = arith.constant dense<0.000000e+00> : vector<16x256xf32>
    %44 = tpu.matmul %41, %43, %cst_24 {dimension_numbers = #tpu.dot_dimension_numbers<[1], [0], [0], [1], [0, 0, 1, 1], [], []>} : vector<16x256xbf16>, vector<256x256xbf16>, vector<16x256xf32> -> vector<16x256xf32>
    %c3 = arith.constant 3 : index
    %c0_25 = arith.constant 0 : index
    %45 = vector.load %arg5[%c3, %c0_25] : memref<8x256xf32, #tpu.memory_space<vmem>>, vector<1x256xf32>
    %46 = vector.shape_cast %45 : vector<1x256xf32> to vector<256xf32>
    %47 = vector.shape_cast %46 : vector<256xf32> to vector<1x256xf32>
    %48 = vector.broadcast %47 : vector<1x256xf32> to vector<16x256xf32>
    %49 = arith.addf %44, %48 : vector<16x256xf32>
    %50 = arith.truncf %49 : vector<16x256xf32> to vector<16x256xbf16>
    %c3_26 = arith.constant 3 : index
    %c0_27 = arith.constant 0 : index
    %c0_28 = arith.constant 0 : index
    %51 = vector.load %arg3[%c3_26, %c0_27, %c0_28] : memref<5x256x256xbf16, #tpu.memory_space<vmem>>, vector<1x256x256xbf16>
    %52 = vector.shape_cast %51 : vector<1x256x256xbf16> to vector<256x256xbf16>
    %cst_29 = arith.constant dense<0.000000e+00> : vector<16x256xf32>
    %53 = tpu.matmul %50, %52, %cst_29 {dimension_numbers = #tpu.dot_dimension_numbers<[1], [0], [0], [1], [0, 0, 1, 1], [], []>} : vector<16x256xbf16>, vector<256x256xbf16>, vector<16x256xf32> -> vector<16x256xf32>
    %c4 = arith.constant 4 : index
    %c0_30 = arith.constant 0 : index
    %54 = vector.load %arg5[%c4, %c0_30] : memref<8x256xf32, #tpu.memory_space<vmem>>, vector<1x256xf32>
    %55 = vector.shape_cast %54 : vector<1x256xf32> to vector<256xf32>
    %56 = vector.shape_cast %55 : vector<256xf32> to vector<1x256xf32>
    %57 = vector.broadcast %56 : vector<1x256xf32> to vector<16x256xf32>
    %58 = arith.addf %53, %57 : vector<16x256xf32>
    %cst_31 = arith.constant 0.000000e+00 : f32
    %59 = vector.broadcast %cst_31 : f32 to vector<16x256xf32>
    %60 = arith.maximumf %58, %59 : vector<16x256xf32>
    %61 = arith.truncf %60 : vector<16x256xf32> to vector<16x256xbf16>
    %c4_32 = arith.constant 4 : index
    %c0_33 = arith.constant 0 : index
    %c0_34 = arith.constant 0 : index
    %62 = vector.load %arg3[%c4_32, %c0_33, %c0_34] : memref<5x256x256xbf16, #tpu.memory_space<vmem>>, vector<1x256x256xbf16>
    %63 = vector.shape_cast %62 : vector<1x256x256xbf16> to vector<256x256xbf16>
    %cst_35 = arith.constant dense<0.000000e+00> : vector<16x256xf32>
    %64 = tpu.matmul %61, %63, %cst_35 {dimension_numbers = #tpu.dot_dimension_numbers<[1], [0], [0], [1], [0, 0, 1, 1], [], []>} : vector<16x256xbf16>, vector<256x256xbf16>, vector<16x256xf32> -> vector<16x256xf32>
    %c5 = arith.constant 5 : index
    %c0_36 = arith.constant 0 : index
    %65 = vector.load %arg5[%c5, %c0_36] : memref<8x256xf32, #tpu.memory_space<vmem>>, vector<1x256xf32>
    %66 = vector.shape_cast %65 : vector<1x256xf32> to vector<256xf32>
    %67 = vector.shape_cast %66 : vector<256xf32> to vector<1x256xf32>
    %68 = vector.broadcast %67 : vector<1x256xf32> to vector<16x256xf32>
    %69 = arith.addf %64, %68 : vector<16x256xf32>
    %cst_37 = arith.constant 0.000000e+00 : f32
    %70 = vector.broadcast %cst_37 : f32 to vector<16x256xf32>
    %71 = arith.maximumf %69, %70 : vector<16x256xf32>
    %c0_38 = arith.constant 0 : index
    %c0_39 = arith.constant 0 : index
    %72 = vector.load %arg4[%c0_38, %c0_39] : memref<1x256xf32, #tpu.memory_space<vmem>>, vector<1x256xf32>
    %73 = vector.broadcast %72 : vector<1x256xf32> to vector<16x256xf32>
    %74 = arith.mulf %71, %73 : vector<16x256xf32>
    %cst_40 = arith.constant dense<0.000000e+00> : vector<16xf32>
    %75 = vector.multi_reduction <add>, %74, %cst_40 [1] : vector<16x256xf32> to vector<16xf32>
    %76 = vector.shape_cast %75 : vector<16xf32> to vector<16x1xf32>
    %c6 = arith.constant 6 : index
    %c0_41 = arith.constant 0 : index
    %77 = vector.load %arg5[%c6, %c0_41] : memref<8x256xf32, #tpu.memory_space<vmem>>, vector<1x1xf32>
    %78 = vector.shape_cast %77 : vector<1x1xf32> to vector<1xf32>
    %79 = vector.shape_cast %78 : vector<1xf32> to vector<1x1xf32>
    %80 = vector.broadcast %79 : vector<1x1xf32> to vector<16x1xf32>
    %81 = arith.addf %76, %80 : vector<16x1xf32>
    %c0_42 = arith.constant 0 : index
    %c0_43 = arith.constant 0 : index
    %82 = vector.load %arg6[%c0_42, %c0_43] : memref<16x1xf32, #tpu.memory_space<vmem>>, vector<16x1xf32>
    tpu.vector_store %arg6[%c0_42, %c0_43], %81 {strides = array<i32>} : memref<16x1xf32, #tpu.memory_space<vmem>>, vector<16x1xf32>,
    return
  }
  func.func @transform_0(%arg0: i32) -> (i32, i32) {
    %c0_i32 = arith.constant 0 : i32
    %c0_i32_0 = arith.constant 0 : i32
    return %arg0, %c0_i32 : i32, i32
  }
  func.func @transform_1(%arg0: i32) -> (i32, i32) {
    %c0_i32 = arith.constant 0 : i32
    %c0_i32_0 = arith.constant 0 : i32
    %c0_i32_1 = arith.constant 0 : i32
    return %c0_i32, %c0_i32_0 : i32, i32
  }
  func.func @transform_2(%arg0: i32) -> (i32, i32, i32) {
    %c0_i32 = arith.constant 0 : i32
    %c0_i32_0 = arith.constant 0 : i32
    %c0_i32_1 = arith.constant 0 : i32
    %c0_i32_2 = arith.constant 0 : i32
    return %c0_i32, %c0_i32_0, %c0_i32_1 : i32, i32, i32
  }
  func.func @transform_3(%arg0: i32) -> (i32, i32) {
    %c0_i32 = arith.constant 0 : i32
    %c0_i32_0 = arith.constant 0 : i32
    %c0_i32_1 = arith.constant 0 : i32
    return %c0_i32, %c0_i32_0 : i32, i32
  }
  func.func @transform_4(%arg0: i32) -> (i32, i32) {
    %c0_i32 = arith.constant 0 : i32
    %c0_i32_0 = arith.constant 0 : i32
    %c0_i32_1 = arith.constant 0 : i32
    return %c0_i32, %c0_i32_0 : i32, i32
  }
  func.func @transform_5(%arg0: i32) -> (i32, i32) {
    %c0_i32 = arith.constant 0 : i32
    %c0_i32_0 = arith.constant 0 : i32
    return %arg0, %c0_i32 : i32, i32
  }
}

</mosaic_0001>

<bundles_post_ra>
// kernel: tpu_custom_call.1
= control target key start
LH: loop header
LB: loop body
LE: loop exit
PB: predicated region body
PF: predicated region fallthrough
CT: control target
= control target key end

     0   :  { %10 = vsyncpa [#allocation3], 0  ;;  %s2255_s18 = smov 0   ;;  %s2372_s0 = inlined_call_operand.vmem [shape: bf16[48,32], index: 0, kind: input, shape index: {}]   ;;  %s2373_s1 = inlined_call_operand.vmem [shape: bf16[32,256], index: 1, kind: input, shape index: {}]   ;;  %s2374_s2 = inlined_call_operand.hbm [shape: bf16[5,256,256], index: 2, kind: input, shape index: {}]   ;;  %s2375_s3 = inlined_call_operand.vmem [shape: f32[1,256], index: 3, kind: input, shape index: {}]   ;;  %s2376_s4 = inlined_call_operand.vmem [shape: f32[8,256], index: 4, kind: input, shape index: {}]   ;;  %s2377_s5 = inlined_call_operand.vmem [shape: f32[48,1], index: 5, kind: output, shape index: {}]  }
   0x1 LB: > { %s1728_s19 = sadd.s32 4294967295, %s2219_s18   ;;  %p1730_p0 = scmp.ge.s32.totalorder %s2219_s18, 1  ;;  %s2219_s18 = sphi %s2255_s18, %s16_s18  }
   0x2   : > { %p157_p1 = scmp.lt.s32.totalorder %s2219_s18, 4  ;;  %s2221_s20 = smov [#allocation2]  }
   0x3   : > { %s172_s21 = sshll.u32 %s2221_s20, 4  ;;  %p2269_p3 = scmp.eq.s32.totalorder %s1728_s19, 0  ;;  %s173_s21 = int_to_ptr.vmem [resolvable:$true] %s172_s21 }
   0x4   : > { %p2263_p2 = pnand %p1730_p0, %p157_p1  ;;  %s2181_s27 = scalar_lea.hbm %s2374_s2, 20480 }
   0x5   : > { %s2382_s23 = scalar_select %p2269_p3, 1, 0 }
   0x6   : > { %s2381_s22 = scalar_select %p2263_p2, 1, 0 }
   0x7   : > { %p1916_p4 = pneg %p2263_p2  ;;  %p2182_p6 = scmp.ne.s32.totalorder %s2374_s2, %s2181_s27 }
   0x8   : > { %p2188_p10 = scmp.lt.u32.totalorder %s2181_s27, %s2374_s2 }
   0x9   : > { %p2277_p5 = pnand %p2269_p3, %p1916_p4 }
   0xb   : > { %p2183_p7 = pneg %p2277_p5 }
   0xd   : > { %p2184_p8 = pnand %p2183_p7, %p2182_p6 }
   0xf   : > { %p2185_p9 = pneg %p2184_p8 }
  0x11   : > { %p2190_p11 = pnand %p2188_p10, %p2185_p9 }
  0x13   : > { %2193 = shalt.err (!%p2190_p11)
}
  0x14   : > { %s2194_s7 = scalar_lea.vmem %s173_s21, 20480  ;;  %p2202_p1 = scmp.lt.s32.totalorder %s173_s21, %s173_s21 }
  0x15   : > { %p2195_p12 = scmp.ne.s32.totalorder %s173_s21, %s2194_s7  ;;  %p2203_p4 = scmp.lt.s32.totalorder %s2194_s7, %s2194_s7 }
  0x17   : > { %p2197_p13 = pnand %p2195_p12, %p2183_p7  ;;  %p2204_p3 = por %p2203_p4, %p2202_p1 }
  0x19   : > { %p2198_p0 = pneg %p2197_p13 }
  0x1b   : > { %p2205_p2 = pnand %p2204_p3, %p2198_p0 }
  0x1d   : > { %2208 = shalt.err (!%p2205_p2)
}
  0x1e   : > { %s2222_s8 = smov 128   ;;  %s2223_s9 = smov 8  }
  0x1f   : > { %1919 = dma.hbm_to_vmem [thread:$0]  (!%p2277_p5), %s2374_s2, 20480, %s173_s21, [#allocation3], %s2222_s8, %s2222_s8, %s2223_s9  }
  0x20   : > { %p2384_p6 = scmp.ne.s32.totalorder %s2381_s22, 0 }
  0x21   : > { %p2385_p8 = scmp.ne.s32.totalorder (!%p2384_p6), %s2382_s23, 0 }
  0x22   : > { %203 = sbr.rel (%p2384_p6) target bundleno = 1532 (0x5fc), region = 40 }
  0x29   : > { %2214 = dma.done.wait (%p2385_p8), [#allocation3], 20480  }
  0x2a   : > { %2216 = vsyncadd (%p2385_p8), [#allocation3], 4294946816  ;;  %s1735_s12 = sshll.u32 %s1728_s19, 1  ;;  %v2224_v0 = vmov 0   ;;  %v1934_v1 = vld [vmem:[%s2373_s1 + $0x4] ss:$8 sps:$4 sm:$0xff]  }
  0x2b   : > { %323 = vmatprep.mubr.bf16.mxu0 %v2224_v0  ;;  %p232_p2 = scmp.lt.s32.totalorder %s1735_s12, 5  ;;  %v1936_v2 = vld [vmem:[%s2373_s1] ss:$8 sps:$4 sm:$0xff]   ;;  %291 = vmatprep.subr.bf16.mxu0 %v1934_v1  ;;  %v1937_v3 = vld [vmem:[%s2373_s1 + $0x14] ss:$8 sps:$4 sm:$0xff]   ;;  %vm287_vm0 = vcmask 261120   ;;  %v252_v0 = vlaneseq }
  0x2c   : > { %292 = vmatpush1.bf16.msra.mxu0 %v1936_v2  ;;  %v1939_v4 = vld [vmem:[%s2373_s1 + $0x10] ss:$8 sps:$4 sm:$0xff]   ;;  %v1941_v5 = vld [vmem:[#allocation2 + $0x4] ss:$8 sps:$4 sm:$0xff]   ;;  %v1944_v7 = vld [vmem:[#allocation2 + $0x14] ss:$8 sps:$4 sm:$0xff]  }
  0x2d   : > { %s2387_s12 = smov (!%p232_p2, %s1735_s12), 5  ;;  %293 = vmatprep.subr.bf16.mxu0 %v1937_v3  ;;  %v1943_v6 = vld [vmem:[#allocation2] ss:$8 sps:$4 sm:$0xff]   ;;  %553 = vmatprep.subr.bf16.mxu1 %v1941_v5  ;;  %v1946_v9 = vld [vmem:[#allocation2 + $0x10] ss:$8 sps:$4 sm:$0xff]   ;;  %v253_v1 = vshrl.u32 %v252_v0, 7 }
  0x2e   : > { %s1736_s13 = sshll.u32 %s2387_s12, 2  ;;  %554 = vmatpush1.bf16.msra.mxu1 %v1943_v6  ;;  %v1947_v10 = vld [vmem:[#allocation2 + $0x24] ss:$8 sps:$4 sm:$0xff]   ;;  %v1949_v11 = vld [vmem:[#allocation2 + $0x20] ss:$8 sps:$4 sm:$0xff]   ;;  %s1738_s16 = sshll.u32 %s2387_s12, 3 }
  0x2f   : > { %s235_s22 = scalar_lea.vmem %s2372_s0, %s1736_s13  ;;  %555 = vmatprep.subr.bf16.mxu1 %v1944_v7  ;;  %v1950_v12 = vld [vmem:[#allocation2 + $0x34] ss:$8 sps:$4 sm:$0xff]   ;;  %v1952_v13 = vld [vmem:[#allocation2 + $0x30] ss:$8 sps:$4 sm:$0xff]   ;;  %v1953_v14 = vld [vmem:[#allocation2 + $0x44] ss:$8 sps:$4 sm:$0xff]   ;;  %s241_s19 = scalar_lea.vmem %s2377_s5, %s1738_s16 }
  0x30   : > { %v1940_v8 = vld [vmem:[%s235_s22] sm:$0xff]   ;;  %294 = vmatpush1.bf16.msra.mxu0 %v1939_v4  ;;  %v1955_v15 = vld [vmem:[#allocation2 + $0x40] ss:$8 sps:$4 sm:$0xff]   ;;  %v1959_v18 = vld [vmem:[#allocation2 + $0x64] ss:$8 sps:$4 sm:$0xff]   ;;  %v2323_v2 = vsub.s32 0, %v253_v1 }
  0x31   : > { %v1956_v16 = vld [vmem:[#allocation2 + $0x54] ss:$8 sps:$4 sm:$0xff]   ;;  %v1958_v17 = vld [vmem:[#allocation2 + $0x50] ss:$8 sps:$4 sm:$0xff]   ;;  %v1961_v19 = vld [vmem:[#allocation2 + $0x60] ss:$8 sps:$4 sm:$0xff]  }
  0x32   : > { %556 = vmatpush1.bf16.msra.mxu1 %v1946_v9  ;;  %v1962_v20 = vld [vmem:[#allocation2 + $0x74] ss:$8 sps:$4 sm:$0xff]   ;;  %v1964_v21 = vld [vmem:[#allocation2 + $0x70] ss:$8 sps:$4 sm:$0xff]   ;;  %v1965_v22 = vld [vmem:[#allocation2 + $0x84] ss:$8 sps:$4 sm:$0xff]  }
  0x33   : > { %1744 = vmatmul.mubr.msk.bf16.vlgmr.msra.gmra.mrb[0].mxu0 %vm287_vm0, %v1940_v8  ;;  %557 = vmatprep.subr.bf16.mxu1 %v1947_v10  ;;  %v1967_v23 = vld [vmem:[#allocation2 + $0x80] ss:$8 sps:$4 sm:$0xff]   ;;  %v1968_v24 = vld [vmem:[#allocation2 + $0x94] ss:$8 sps:$4 sm:$0xff]   ;;  %v1970_v25 = vld [vmem:[#allocation2 + $0x90] ss:$8 sps:$4 sm:$0xff]  }
  0x34   : > { %v1971_v26 = vld [vmem:[#allocation2 + $0xa4] ss:$8 sps:$4 sm:$0xff]   ;;  %v1973_v27 = vld [vmem:[#allocation2 + $0xa0] ss:$8 sps:$4 sm:$0xff]   ;;  %v1974_v28 = vld [vmem:[#allocation2 + $0xb4] ss:$8 sps:$4 sm:$0xff]  }
  0x35   : > { %v1976_v29 = vld [vmem:[#allocation2 + $0xb0] ss:$8 sps:$4 sm:$0xff]   ;;  %v1977_v30 = vld [vmem:[#allocation2 + $0xc4] ss:$8 sps:$4 sm:$0xff]   ;;  %v1979_v31 = vld [vmem:[#allocation2 + $0xc0] ss:$8 sps:$4 sm:$0xff]  }
  0x36   : > { %558 = vmatpush1.bf16.msra.mxu1 %v1949_v11  ;;  %v1980_v32 = vld [vmem:[#allocation2 + $0xd4] ss:$8 sps:$4 sm:$0xff]   ;;  %v1982_v33 = vld [vmem:[#allocation2 + $0xd0] ss:$8 sps:$4 sm:$0xff]   ;;  %v1983_v34 = vld [vmem:[#allocation2 + $0xe4] ss:$8 sps:$4 sm:$0xff]  }
  0x37   : > { %559 = vmatprep.subr.bf16.mxu1 %v1950_v12  ;;  %v1985_v35 = vld [vmem:[#allocation2 + $0xe0] ss:$8 sps:$4 sm:$0xff]   ;;  %v1986_v36 = vld [vmem:[#allocation2 + $0xf4] ss:$8 sps:$4 sm:$0xff]   ;;  %v1988_v37 = vld [vmem:[#allocation2 + $0xf0] ss:$8 sps:$4 sm:$0xff]  }
  0x38   : > { %v1989_v38 = vld [vmem:[#allocation2 + $0x100] ss:$8 sps:$4 sm:$0xff]   ;;  %v1991_v39 = vld [vmem:[#allocation2 + $0x104] ss:$8 sps:$4 sm:$0xff]   ;;  %v1994_v40 = vld [vmem:[#allocation2 + $0x114] ss:$8 sps:$4 sm:$0xff]  }
  0x39   : > { %816 = vmatprep.subr.bf16.mxu0 %v1991_v39  ;;  %v1992_v41 = vld [vmem:[#allocation2 + $0x110] ss:$8 sps:$4 sm:$0xff]   ;;  %v1997_v42 = vld [vmem:[#allocation2 + $0x124] ss:$8 sps:$4 sm:$0xff]   ;;  %v1995_v43 = vld [vmem:[#allocation2 + $0x120] ss:$8 sps:$4 sm:$0xff]  }
  0x3a   : > { %560 = vmatpush1.bf16.msra.mxu1 %v1952_v13  ;;  %817 = vmatpush1.bf16.msra.mxu0 %v1989_v38  ;;  %v2000_v44 = vld [vmem:[#allocation2 + $0x134] ss:$8 sps:$4 sm:$0xff]   ;;  %v1998_v45 = vld [vmem:[#allocation2 + $0x130] ss:$8 sps:$4 sm:$0xff]   ;;  %v2003_v46 = vld [vmem:[#allocation2 + $0x144] ss:$8 sps:$4 sm:$0xff]  }
  0x3b   : > { %561 = vmatprep.subr.bf16.mxu1 %v1953_v14  ;;  %818 = vmatprep.subr.bf16.mxu0 %v1994_v40  ;;  %v2001_v47 = vld [vmem:[#allocation2 + $0x140] ss:$8 sps:$4 sm:$0xff]   ;;  %v2006_v48 = vld [vmem:[#allocation2 + $0x154] ss:$8 sps:$4 sm:$0xff]   ;;  %v2004_v49 = vld [vmem:[#allocation2 + $0x150] ss:$8 sps:$4 sm:$0xff]  }
  0x3c   : > { %v2009_v50 = vld [vmem:[#allocation2 + $0x164] ss:$8 sps:$4 sm:$0xff]   ;;  %v2007_v51 = vld [vmem:[#allocation2 + $0x160] ss:$8 sps:$4 sm:$0xff]   ;;  %v2012_v52 = vld [vmem:[#allocation2 + $0x174] ss:$8 sps:$4 sm:$0xff]  }
  0x3d   : > { %v2010_v53 = vld [vmem:[#allocation2 + $0x170] ss:$8 sps:$4 sm:$0xff]   ;;  %v2015_v54 = vld [vmem:[#allocation2 + $0x184] ss:$8 sps:$4 sm:$0xff]   ;;  %v2013_v55 = vld [vmem:[#allocation2 + $0x180] ss:$8 sps:$4 sm:$0xff]  }
  0x3e   : > { %562 = vmatpush1.bf16.msra.mxu1 %v1955_v15  ;;  %819 = vmatpush1.bf16.msra.mxu0 %v1992_v41  ;;  %v2018_v56 = vld [vmem:[#allocation2 + $0x194] ss:$8 sps:$4 sm:$0xff]   ;;  %v2016_v57 = vld [vmem:[#allocation2 + $0x190] ss:$8 sps:$4 sm:$0xff]   ;;  %v2021_v58 = vld [vmem:[#allocation2 + $0x1a4] ss:$8 sps:$4 sm:$0xff]  }
  0x3f   : > { %563 = vmatprep.subr.bf16.mxu1 %v1956_v16  ;;  %820 = vmatprep.subr.bf16.mxu0 %v1997_v42  ;;  %v2019_v59 = vld [vmem:[#allocation2 + $0x1a0] ss:$8 sps:$4 sm:$0xff]   ;;  %v2024_v60 = vld [vmem:[#allocation2 + $0x1b4] ss:$8 sps:$4 sm:$0xff]   ;;  %v2022_v61 = vld [vmem:[#allocation2 + $0x1b0] ss:$8 sps:$4 sm:$0xff]  }
  0x40   : > { %v2027_v62 = vld [vmem:[#allocation2 + $0x1c4] ss:$8 sps:$4 sm:$0xff]   ;;  %v2025_v63 = vld [vmem:[#allocation2 + $0x1c0] ss:$8 sps:$4 sm:$0xff]   ;;  %v2328_v4 = vsub.s32 1, %v253_v1  ;;  %vm1657_vm13 = vcmask 7168  }
  0x41   : > { %v250_v3 = vld [vmem:[%s2376_s4] ss:$8 sm:$0x3]  ;;  %v2051_v39 = vld [vmem:[#allocation2 + $0x244] ss:$8 sps:$4 sm:$0xff]  }
  0x42   : > { %564 = vmatpush1.bf16.msra.mxu1 %v1958_v17  ;;  %821 = vmatpush1.bf16.msra.mxu0 %v1995_v43  ;;  %v255_v5 = vrot.slane %v250_v3, %v2323_v2  ;;  %v259_v6 = vrot.slane %v250_v3, %v2328_v4  ;;  %v2046_v38 = vld [vmem:[#allocation2 + $0x230] ss:$8 sps:$4 sm:$0xff]   ;;  %v2049_v40 = vld [vmem:[#allocation2 + $0x240] ss:$8 sps:$4 sm:$0xff]   ;;  %v2054_v41 = vld [vmem:[#allocation2 + $0x254] ss:$8 sps:$4 sm:$0xff]  }
  0x43   : > { %565 = vmatprep.subr.bf16.mxu1 %v1959_v18  ;;  %822 = vmatprep.subr.bf16.mxu0 %v2000_v44  ;;  %v2052_v42 = vld [vmem:[#allocation2 + $0x250] ss:$8 sps:$4 sm:$0xff]   ;;  %v2057_v43 = vld [vmem:[#allocation2 + $0x264] ss:$8 sps:$4 sm:$0xff]   ;;  %v2055_v44 = vld [vmem:[#allocation2 + $0x260] ss:$8 sps:$4 sm:$0xff]  }
  0x46   : > { %566 = vmatpush1.bf16.msra.mxu1 %v1961_v19  ;;  %823 = vmatpush1.bf16.msra.mxu0 %v1998_v45  ;;  %v2060_v45 = vld [vmem:[#allocation2 + $0x274] ss:$8 sps:$4 sm:$0xff]  }
  0x47   : > { %567 = vmatprep.subr.bf16.mxu1 %v1962_v20  ;;  %824 = vmatprep.subr.bf16.mxu0 %v2003_v46  ;;  %v2058_v46 = vld [vmem:[#allocation2 + $0x270] ss:$8 sps:$4 sm:$0xff]  }
  0x4a   : > { %568 = vmatpush1.bf16.msra.mxu1 %v1964_v21  ;;  %825 = vmatpush1.bf16.msra.mxu0 %v2001_v47  ;;  %v2063_v47 = vld [vmem:[#allocation2 + $0x284] ss:$8 sps:$4 sm:$0xff]  }
  0x4b   : > { %569 = vmatprep.subr.bf16.mxu1 %v1965_v22  ;;  %826 = vmatprep.subr.bf16.mxu0 %v2006_v48  ;;  %v2061_v48 = vld [vmem:[#allocation2 + $0x280] ss:$8 sps:$4 sm:$0xff]  }
  0x4e   : > { %570 = vmatpush1.bf16.msra.mxu1 %v1967_v23  ;;  %827 = vmatpush1.bf16.msra.mxu0 %v2004_v49  ;;  %v2066_v49 = vld [vmem:[#allocation2 + $0x294] ss:$8 sps:$4 sm:$0xff]  }
  0x4f   : > { %571 = vmatprep.subr.bf16.mxu1 %v1968_v24  ;;  %828 = vmatprep.subr.bf16.mxu0 %v2009_v50  ;;  %v2064_v50 = vld [vmem:[#allocation2 + $0x290] ss:$8 sps:$4 sm:$0xff]  }
  0x52   : > { %572 = vmatpush1.bf16.msra.mxu1 %v1970_v25  ;;  %829 = vmatpush1.bf16.msra.mxu0 %v2007_v51  ;;  %v2030_v25 = vld [vmem:[#allocation2 + $0x1d4] ss:$8 sps:$4 sm:$0xff]   ;;  %v2069_v51 = vld [vmem:[#allocation2 + $0x2a4] ss:$8 sps:$4 sm:$0xff]  }
  0x53   : > { %573 = vmatprep.subr.bf16.mxu1 %v1971_v26  ;;  %830 = vmatprep.subr.bf16.mxu0 %v2012_v52  ;;  %v2028_v26 = vld [vmem:[#allocation2 + $0x1d0] ss:$8 sps:$4 sm:$0xff]   ;;  %v2067_v52 = vld [vmem:[#allocation2 + $0x2a0] ss:$8 sps:$4 sm:$0xff]  }
  0x56   : > { %574 = vmatpush1.bf16.msra.mxu1 %v1973_v27  ;;  %831 = vmatpush1.bf16.msra.mxu0 %v2010_v53  ;;  %v2033_v27 = vld [vmem:[#allocation2 + $0x1e4] ss:$8 sps:$4 sm:$0xff]   ;;  %v2072_v53 = vld [vmem:[#allocation2 + $0x2b4] ss:$8 sps:$4 sm:$0xff]  }
  0x57   : > { %575 = vmatprep.subr.bf16.mxu1 %v1974_v28  ;;  %832 = vmatprep.subr.bf16.mxu0 %v2015_v54  ;;  %v2031_v28 = vld [vmem:[#allocation2 + $0x1e0] ss:$8 sps:$4 sm:$0xff]   ;;  %v2070_v54 = vld [vmem:[#allocation2 + $0x2b0] ss:$8 sps:$4 sm:$0xff]  }
  0x5a   : > { %576 = vmatpush1.bf16.msra.mxu1 %v1976_v29  ;;  %833 = vmatpush1.bf16.msra.mxu0 %v2013_v55  ;;  %v2036_v29 = vld [vmem:[#allocation2 + $0x1f4] ss:$8 sps:$4 sm:$0xff]   ;;  %v2075_v55 = vld [vmem:[#allocation2 + $0x2c4] ss:$8 sps:$4 sm:$0xff]  }
  0x5b   : > { %577 = vmatprep.subr.bf16.mxu1 %v1977_v30  ;;  %834 = vmatprep.subr.bf16.mxu0 %v2018_v56  ;;  %v2034_v30 = vld [vmem:[#allocation2 + $0x1f0] ss:$8 sps:$4 sm:$0xff]   ;;  %v2073_v56 = vld [vmem:[#allocation2 + $0x2c0] ss:$8 sps:$4 sm:$0xff]  }
  0x5e   : > { %578 = vmatpush1.bf16.msra.mxu1 %v1979_v31  ;;  %835 = vmatpush1.bf16.msra.mxu0 %v2016_v57  ;;  %v2037_v31 = vld [vmem:[#allocation2 + $0x200] ss:$8 sps:$4 sm:$0xff]   ;;  %v1745_v57 = vld [vmem:[%s2376_s4 + $0x1] ss:$8 sm:$0x3] }
  0x5f   : > { %579 = vmatprep.subr.bf16.mxu1 %v1980_v32  ;;  %836 = vmatprep.subr.bf16.mxu0 %v2021_v58  ;;  %v2039_v32 = vld [vmem:[#allocation2 + $0x204] ss:$8 sps:$4 sm:$0xff]   ;;  %v386_v58 = vrot.slane %v1745_v57, %v2323_v2 }
  0x62   : > { %580 = vmatpush1.bf16.msra.mxu1 %v1982_v33  ;;  %837 = vmatpush1.bf16.msra.mxu0 %v2019_v59  ;;  %v2042_v33 = vld [vmem:[#allocation2 + $0x214] ss:$8 sps:$4 sm:$0xff]   ;;  %v390_v59 = vrot.slane %v1745_v57, %v2328_v4 }
  0x63   : > { %581 = vmatprep.subr.bf16.mxu1 %v1983_v34  ;;  %838 = vmatprep.subr.bf16.mxu0 %v2024_v60  ;;  %v2040_v34 = vld [vmem:[#allocation2 + $0x210] ss:$8 sps:$4 sm:$0xff]  }
  0x66   : > { %582 = vmatpush1.bf16.msra.mxu1 %v1985_v35  ;;  %839 = vmatpush1.bf16.msra.mxu0 %v2022_v61  ;;  %v2045_v35 = vld [vmem:[#allocation2 + $0x224] ss:$8 sps:$4 sm:$0xff]  }
  0x67   : > { %583 = vmatprep.subr.bf16.mxu1 %v1986_v36  ;;  %840 = vmatprep.subr.bf16.mxu0 %v2027_v62  ;;  %v2043_v36 = vld [vmem:[#allocation2 + $0x220] ss:$8 sps:$4 sm:$0xff]  }
  0x6a   : > { %584 = vmatpush1.bf16.msra.mxu1 %v1988_v37  ;;  %841 = vmatpush1.bf16.msra.mxu0 %v2025_v63  ;;  %v2048_v37 = vld [vmem:[#allocation2 + $0x234] ss:$8 sps:$4 sm:$0xff]  }
  0x6b   : > { %842 = vmatprep.subr.bf16.mxu0 %v2030_v25  ;;  %1079 = vmatprep.subr.bf16.mxu1 %v2039_v32  ;;  %v2088_v25 = vld [vmem:[#allocation2 + $0x310] ss:$8 sps:$4 sm:$0xff]   ;;  %v2102_v32 = vld [vmem:[#allocation2 + $0x354] ss:$8 sps:$4 sm:$0xff]  }
  0x6e   : > { %843 = vmatpush1.bf16.msra.mxu0 %v2028_v26  ;;  %v2093_v26 = vld [vmem:[#allocation2 + $0x324] ss:$8 sps:$4 sm:$0xff]  }
  0x6f   : > { %844 = vmatprep.subr.bf16.mxu0 %v2033_v27  ;;  %v2091_v27 = vld [vmem:[#allocation2 + $0x320] ss:$8 sps:$4 sm:$0xff]  }
  0x72   : > { %845 = vmatpush1.bf16.msra.mxu0 %v2031_v28  ;;  %v2096_v28 = vld [vmem:[#allocation2 + $0x334] ss:$8 sps:$4 sm:$0xff]  }
  0x73   : > { %846 = vmatprep.subr.bf16.mxu0 %v2036_v29  ;;  %v2094_v29 = vld [vmem:[#allocation2 + $0x330] ss:$8 sps:$4 sm:$0xff]  }
  0x76   : > { %847 = vmatpush1.bf16.msra.mxu0 %v2034_v30  ;;  %v2099_v30 = vld [vmem:[#allocation2 + $0x344] ss:$8 sps:$4 sm:$0xff]  }
 0x106   : > { %v325_v7 = vpop.f32.mrb[0].mxu0 }
 0x107   : > { %v326_v8 = vadd.f32 %v325_v7, %v255_v5  ;;  %v327_v9 = vpop.f32.mrb[1].mxu0 }
 0x108   : > { %v328_v10 = vadd.f32 %v327_v9, %v259_v6  ;;  %v329_v11 = vpop.f32.mrb[2].mxu0 }
 0x109   : > { %v338_v12 = vmul.f32 0.2, %v326_v8  ;;  %v330_v13 = vadd.f32 %v329_v11, %v255_v5  ;;  %v331_v14 = vpop.f32.mrb[3].mxu0  ;;  %vm334_vm1 = vcmp.gt.f32.partialorder %v326_v8, 0.0 }
 0x10a   : > { %v339_v15 = vmul.f32 0.2, %v328_v10  ;;  %v332_v16 = vadd.f32 %v331_v14, %v259_v6  ;;  %vm335_vm3 = vcmp.gt.f32.partialorder %v328_v10, 0.0 }
 0x10b   : > { %vm336_vm2 = vcmp.gt.f32.partialorder %v330_v13, 0.0  ;;  %v340_v17 = vmul.f32 0.2, %v330_v13  ;;  %v342_v19 = vsel %vm334_vm1, %v326_v8, %v338_v12 }
 0x10c   : > { %v341_v18 = vmul.f32 0.2, %v332_v16  ;;  %vm337_vm4 = vcmp.gt.f32.partialorder %v332_v16, 0.0  ;;  %v343_v21 = vsel %vm335_vm3, %v328_v10, %v339_v15 }
 0x10d   : > { %v344_v20 = vsel %vm336_vm2, %v330_v13, %v340_v17  ;;  %v2076_v17 = vld [vmem:[#allocation2 + $0x2d0] ss:$8 sps:$4 sm:$0xff]  }
 0x10e   : > { %v345_v22 = vsel %vm337_vm4, %v332_v16, %v341_v18  ;;  %v346_v23 = vpack.c.bf16 %v344_v20, %v342_v19  ;;  %v2078_v16 = vld [vmem:[#allocation2 + $0x2d4] ss:$8 sps:$4 sm:$0xff]   ;;  %v2081_v18 = vld [vmem:[#allocation2 + $0x2e4] ss:$8 sps:$4 sm:$0xff]   ;;  %v2079_v19 = vld [vmem:[#allocation2 + $0x2e0] ss:$8 sps:$4 sm:$0xff]  }
 0x10f   : > { %v347_v24 = vpack.c.bf16 %v345_v22, %v343_v21  ;;  %v2084_v20 = vld [vmem:[#allocation2 + $0x2f4] ss:$8 sps:$4 sm:$0xff]   ;;  %v2082_v21 = vld [vmem:[#allocation2 + $0x2f0] ss:$8 sps:$4 sm:$0xff]   ;;  %v2085_v22 = vld [vmem:[#allocation2 + $0x300] ss:$8 sps:$4 sm:$0xff]  }
 0x111   : > { %585 = vmatprep.mubr.bf16.mxu1 %v347_v24  ;;  %v2090_v24 = vld [vmem:[#allocation2 + $0x314] ss:$8 sps:$4 sm:$0xff]  }
 0x112   : > { %586 = vmatmul.mubr.bf16.vlgmr.msra.gmra.mrb[0].mxu1 %v346_v23  ;;  %v2087_v23 = vld [vmem:[#allocation2 + $0x304] ss:$8 sps:$4 sm:$0xff]  }
 0x113   : > { %1080 = vmatpush1.bf16.msra.mxu1 %v2037_v31  ;;  %1330 = vmatprep.subr.bf16.mxu0 %v2087_v23  ;;  %v2097_v31 = vld [vmem:[#allocation2 + $0x340] ss:$8 sps:$4 sm:$0xff]   ;;  %v2150_v23 = vld [vmem:[#allocation2 + $0x454] ss:$8 sps:$4 sm:$0xff]  }
 0x114   : > { %1081 = vmatprep.subr.bf16.mxu1 %v2042_v33  ;;  %v2100_v33 = vld [vmem:[#allocation2 + $0x350] ss:$8 sps:$4 sm:$0xff]  }
 0x117   : > { %1082 = vmatpush1.bf16.msra.mxu1 %v2040_v34  ;;  %v2105_v34 = vld [vmem:[#allocation2 + $0x364] ss:$8 sps:$4 sm:$0xff]  }
 0x118   : > { %1083 = vmatprep.subr.bf16.mxu1 %v2045_v35  ;;  %v2103_v35 = vld [vmem:[#allocation2 + $0x360] ss:$8 sps:$4 sm:$0xff]  }
 0x11b   : > { %1084 = vmatpush1.bf16.msra.mxu1 %v2043_v36  ;;  %v2108_v36 = vld [vmem:[#allocation2 + $0x374] ss:$8 sps:$4 sm:$0xff]  }
 0x11c   : > { %1085 = vmatprep.subr.bf16.mxu1 %v2048_v37  ;;  %v2106_v37 = vld [vmem:[#allocation2 + $0x370] ss:$8 sps:$4 sm:$0xff]  }
 0x11f   : > { %1086 = vmatpush1.bf16.msra.mxu1 %v2046_v38  ;;  %v2111_v38 = vld [vmem:[#allocation2 + $0x384] ss:$8 sps:$4 sm:$0xff]  }
 0x120   : > { %1087 = vmatprep.subr.bf16.mxu1 %v2051_v39  ;;  %v2109_v39 = vld [vmem:[#allocation2 + $0x380] ss:$8 sps:$4 sm:$0xff]  }
 0x123   : > { %1088 = vmatpush1.bf16.msra.mxu1 %v2049_v40  ;;  %v2114_v40 = vld [vmem:[#allocation2 + $0x394] ss:$8 sps:$4 sm:$0xff]  }
 0x124   : > { %1089 = vmatprep.subr.bf16.mxu1 %v2054_v41  ;;  %v2112_v41 = vld [vmem:[#allocation2 + $0x390] ss:$8 sps:$4 sm:$0xff]  }
 0x127   : > { %1090 = vmatpush1.bf16.msra.mxu1 %v2052_v42  ;;  %v2117_v42 = vld [vmem:[#allocation2 + $0x3a4] ss:$8 sps:$4 sm:$0xff]  }
 0x128   : > { %1091 = vmatprep.subr.bf16.mxu1 %v2057_v43  ;;  %v2115_v43 = vld [vmem:[#allocation2 + $0x3a0] ss:$8 sps:$4 sm:$0xff]  }
 0x12b   : > { %1092 = vmatpush1.bf16.msra.mxu1 %v2055_v44  ;;  %v2120_v44 = vld [vmem:[#allocation2 + $0x3b4] ss:$8 sps:$4 sm:$0xff]  }
 0x12c   : > { %1093 = vmatprep.subr.bf16.mxu1 %v2060_v45  ;;  %v2118_v45 = vld [vmem:[#allocation2 + $0x3b0] ss:$8 sps:$4 sm:$0xff]  }
 0x12f   : > { %1094 = vmatpush1.bf16.msra.mxu1 %v2058_v46  ;;  %v2123_v46 = vld [vmem:[#allocation2 + $0x3c4] ss:$8 sps:$4 sm:$0xff]  }
 0x130   : > { %1095 = vmatprep.subr.bf16.mxu1 %v2063_v47  ;;  %v2121_v47 = vld [vmem:[#allocation2 + $0x3c0] ss:$8 sps:$4 sm:$0xff]  }
 0x133   : > { %1096 = vmatpush1.bf16.msra.mxu1 %v2061_v48  ;;  %v2126_v48 = vld [vmem:[#allocation2 + $0x3d4] ss:$8 sps:$4 sm:$0xff]  }
 0x134   : > { %1097 = vmatprep.subr.bf16.mxu1 %v2066_v49  ;;  %v2124_v49 = vld [vmem:[#allocation2 + $0x3d0] ss:$8 sps:$4 sm:$0xff]  }
 0x137   : > { %1098 = vmatpush1.bf16.msra.mxu1 %v2064_v50  ;;  %v1778_v50 = vld [vmem:[%s2376_s4 + $0x2] ss:$8 sm:$0x3] }
 0x138   : > { %1099 = vmatprep.subr.bf16.mxu1 %v2069_v51  ;;  %v649_v51 = vrot.slane %v1778_v50, %v2323_v2 }
 0x13b   : > { %1100 = vmatpush1.bf16.msra.mxu1 %v2067_v52  ;;  %v653_v52 = vrot.slane %v1778_v50, %v2328_v4 }
 0x13c   : > { %1101 = vmatprep.subr.bf16.mxu1 %v2072_v53 }
 0x13f   : > { %1102 = vmatpush1.bf16.msra.mxu1 %v2070_v54 }
 0x140   : > { %1103 = vmatprep.subr.bf16.mxu1 %v2075_v55 }
 0x143   : > { %1104 = vmatpush1.bf16.msra.mxu1 %v2073_v56 }
 0x144   : > { %1105 = vmatprep.subr.bf16.mxu1 %v2078_v16  ;;  %v2136_v16 = vld [vmem:[#allocation2 + $0x410] ss:$8 sps:$4 sm:$0xff]  }
 0x147   : > { %1106 = vmatpush1.bf16.msra.mxu1 %v2076_v17  ;;  %v2141_v17 = vld [vmem:[#allocation2 + $0x424] ss:$8 sps:$4 sm:$0xff]  }
 0x148   : > { %1107 = vmatprep.subr.bf16.mxu1 %v2081_v18  ;;  %v2139_v18 = vld [vmem:[#allocation2 + $0x420] ss:$8 sps:$4 sm:$0xff]  }
 0x14b   : > { %1108 = vmatpush1.bf16.msra.mxu1 %v2079_v19  ;;  %v2144_v19 = vld [vmem:[#allocation2 + $0x434] ss:$8 sps:$4 sm:$0xff]  }
 0x14c   : > { %1109 = vmatprep.subr.bf16.mxu1 %v2084_v20  ;;  %v2142_v20 = vld [vmem:[#allocation2 + $0x430] ss:$8 sps:$4 sm:$0xff]  }
 0x14f   : > { %1110 = vmatpush1.bf16.msra.mxu1 %v2082_v21  ;;  %v2147_v21 = vld [vmem:[#allocation2 + $0x444] ss:$8 sps:$4 sm:$0xff]  }
 0x1e5   : > { %v587_v60 = vpop.f32.mrb[0].mxu1 }
 0x1e6   : > { %v588_v61 = vadd.f32 %v587_v60, %v386_v58  ;;  %v589_v62 = vpop.f32.mrb[1].mxu1 }
 0x1e7   : > { %v590_v63 = vadd.f32 %v589_v62, %v390_v59  ;;  %v591_v0 = vpop.f32.mrb[2].mxu1 }
 0x1e8   : > { %v600_v1 = vmul.f32 0.2, %v588_v61  ;;  %v592_v3 = vadd.f32 %v591_v0, %v386_v58  ;;  %v593_v5 = vpop.f32.mrb[3].mxu1  ;;  %vm596_vm5 = vcmp.gt.f32.partialorder %v588_v61, 0.0 }
 0x1e9   : > { %v601_v6 = vmul.f32 0.2, %v590_v63  ;;  %v594_v7 = vadd.f32 %v593_v5, %v390_v59  ;;  %vm597_vm6 = vcmp.gt.f32.partialorder %v590_v63, 0.0 }
 0x1ea   : > { %vm598_vm7 = vcmp.gt.f32.partialorder %v592_v3, 0.0  ;;  %v602_v8 = vmul.f32 0.2, %v592_v3  ;;  %v604_v10 = vsel %vm596_vm5, %v588_v61, %v600_v1 }
 0x1eb   : > { %vm599_vm8 = vcmp.gt.f32.partialorder %v594_v7, 0.0  ;;  %v603_v9 = vmul.f32 0.2, %v594_v7  ;;  %v605_v13 = vsel %vm597_vm6, %v590_v63, %v601_v6 }
 0x1ec   : > { %v606_v11 = vsel %vm598_vm7, %v592_v3, %v602_v8 }
 0x1ed   : > { %v608_v12 = vpack.c.bf16 %v606_v11, %v604_v10  ;;  %v607_v14 = vsel %vm599_vm8, %v594_v7, %v603_v9  ;;  %v2129_v9 = vld [vmem:[#allocation2 + $0x3e4] ss:$8 sps:$4 sm:$0xff]   ;;  %v2127_v10 = vld [vmem:[#allocation2 + $0x3e0] ss:$8 sps:$4 sm:$0xff]   ;;  %v2132_v11 = vld [vmem:[#allocation2 + $0x3f4] ss:$8 sps:$4 sm:$0xff]  }
 0x1ee   : > { %v609_v15 = vpack.c.bf16 %v607_v14, %v605_v13  ;;  %v2133_v13 = vld [vmem:[#allocation2 + $0x400] ss:$8 sps:$4 sm:$0xff]   ;;  %v2135_v14 = vld [vmem:[#allocation2 + $0x404] ss:$8 sps:$4 sm:$0xff]  }
 0x1ef   : > { %1585 = vmatprep.subr.bf16.mxu1 %v2135_v14 }
 0x1f0   : > { %848 = vmatprep.mubr.bf16.mxu0 %v609_v15  ;;  %v2138_v15 = vld [vmem:[#allocation2 + $0x414] ss:$8 sps:$4 sm:$0xff]  }
 0x1f1   : > { %849 = vmatmul.mubr.bf16.vlgmr.msra.gmra.mrb[4].mxu0 %v608_v12  ;;  %v2130_v12 = vld [vmem:[#allocation2 + $0x3f0] ss:$8 sps:$4 sm:$0xff]  }
 0x1f2   : > { %1331 = vmatpush1.bf16.msra.mxu0 %v2085_v22  ;;  %v2145_v22 = vld [vmem:[#allocation2 + $0x440] ss:$8 sps:$4 sm:$0xff]  }
 0x1f3   : > { %1332 = vmatprep.subr.bf16.mxu0 %v2090_v24  ;;  %v2148_v24 = vld [vmem:[#allocation2 + $0x450] ss:$8 sps:$4 sm:$0xff]  }
 0x1f6   : > { %1333 = vmatpush1.bf16.msra.mxu0 %v2088_v25  ;;  %v2153_v25 = vld [vmem:[#allocation2 + $0x464] ss:$8 sps:$4 sm:$0xff]  }
 0x1f7   : > { %1334 = vmatprep.subr.bf16.mxu0 %v2093_v26  ;;  %v2151_v26 = vld [vmem:[#allocation2 + $0x460] ss:$8 sps:$4 sm:$0xff]  }
 0x1fa   : > { %1335 = vmatpush1.bf16.msra.mxu0 %v2091_v27  ;;  %v2156_v27 = vld [vmem:[#allocation2 + $0x474] ss:$8 sps:$4 sm:$0xff]  }
 0x1fb   : > { %1336 = vmatprep.subr.bf16.mxu0 %v2096_v28  ;;  %v2154_v28 = vld [vmem:[#allocation2 + $0x470] ss:$8 sps:$4 sm:$0xff]  }
 0x1fe   : > { %1337 = vmatpush1.bf16.msra.mxu0 %v2094_v29  ;;  %v2159_v29 = vld [vmem:[#allocation2 + $0x484] ss:$8 sps:$4 sm:$0xff]  }
 0x1ff   : > { %1338 = vmatprep.subr.bf16.mxu0 %v2099_v30  ;;  %v2157_v30 = vld [vmem:[#allocation2 + $0x480] ss:$8 sps:$4 sm:$0xff]  }
 0x202   : > { %1339 = vmatpush1.bf16.msra.mxu0 %v2097_v31  ;;  %v2162_v31 = vld [vmem:[#allocation2 + $0x494] ss:$8 sps:$4 sm:$0xff]  }
 0x203   : > { %1340 = vmatprep.subr.bf16.mxu0 %v2102_v32  ;;  %v2160_v32 = vld [vmem:[#allocation2 + $0x490] ss:$8 sps:$4 sm:$0xff]  }
 0x206   : > { %1341 = vmatpush1.bf16.msra.mxu0 %v2100_v33  ;;  %v2165_v33 = vld [vmem:[#allocation2 + $0x4a4] ss:$8 sps:$4 sm:$0xff]  }
 0x207   : > { %1342 = vmatprep.subr.bf16.mxu0 %v2105_v34  ;;  %v2163_v34 = vld [vmem:[#allocation2 + $0x4a0] ss:$8 sps:$4 sm:$0xff]  }
 0x20a   : > { %1343 = vmatpush1.bf16.msra.mxu0 %v2103_v35  ;;  %v2168_v35 = vld [vmem:[#allocation2 + $0x4b4] ss:$8 sps:$4 sm:$0xff]  }
 0x20b   : > { %1344 = vmatprep.subr.bf16.mxu0 %v2108_v36  ;;  %v2166_v36 = vld [vmem:[#allocation2 + $0x4b0] ss:$8 sps:$4 sm:$0xff]  }
 0x20e   : > { %1345 = vmatpush1.bf16.msra.mxu0 %v2106_v37  ;;  %v2171_v37 = vld [vmem:[#allocation2 + $0x4c4] ss:$8 sps:$4 sm:$0xff]  }
 0x20f   : > { %1346 = vmatprep.subr.bf16.mxu0 %v2111_v38  ;;  %v2169_v38 = vld [vmem:[#allocation2 + $0x4c0] ss:$8 sps:$4 sm:$0xff]  }
 0x212   : > { %1347 = vmatpush1.bf16.msra.mxu0 %v2109_v39  ;;  %v2174_v39 = vld [vmem:[#allocation2 + $0x4d4] ss:$8 sps:$4 sm:$0xff]  }
 0x213   : > { %1348 = vmatprep.subr.bf16.mxu0 %v2114_v40  ;;  %v2172_v40 = vld [vmem:[#allocation2 + $0x4d0] ss:$8 sps:$4 sm:$0xff]  }
 0x216   : > { %1349 = vmatpush1.bf16.msra.mxu0 %v2112_v41  ;;  %v1811_v41 = vld [vmem:[%s2376_s4 + $0x3] ss:$8 sm:$0x3] }
 0x217   : > { %1350 = vmatprep.subr.bf16.mxu0 %v2117_v42  ;;  %v912_v42 = vrot.slane %v1811_v41, %v2323_v2 }
 0x21a   : > { %1351 = vmatpush1.bf16.msra.mxu0 %v2115_v43 }
 0x21b   : > { %1352 = vmatprep.subr.bf16.mxu0 %v2120_v44  ;;  %v916_v44 = vrot.slane %v1811_v41, %v2328_v4 }
 0x21e   : > { %1353 = vmatpush1.bf16.msra.mxu0 %v2118_v45 }
 0x21f   : > { %1354 = vmatprep.subr.bf16.mxu0 %v2123_v46 }
 0x222   : > { %1355 = vmatpush1.bf16.msra.mxu0 %v2121_v47 }
 0x223   : > { %1356 = vmatprep.subr.bf16.mxu0 %v2126_v48 }
 0x226   : > { %1357 = vmatpush1.bf16.msra.mxu0 %v2124_v49 }
 0x227   : > { %1358 = vmatprep.subr.bf16.mxu0 %v2129_v9 }
 0x22a   : > { %1359 = vmatpush1.bf16.msra.mxu0 %v2127_v10 }
 0x22b   : > { %1360 = vmatprep.subr.bf16.mxu0 %v2132_v11 }
 0x22e   : > { %1361 = vmatpush1.bf16.msra.mxu0 %v2130_v12 }
 0x2c4   : > { %v850_v53 = vpop.f32.mrb[4].mxu0 }
 0x2c5   : > { %v851_v54 = vadd.f32 %v850_v53, %v649_v51  ;;  %v852_v55 = vpop.f32.mrb[5].mxu0 }
 0x2c6   : > { %v853_v56 = vadd.f32 %v852_v55, %v653_v52  ;;  %v854_v57 = vpop.f32.mrb[6].mxu0  ;;  %v2175_v55 = vld [vmem:[#allocation2 + $0x4e0] ss:$8 sps:$4 sm:$0xff]  }
 0x2c7   : > { %v863_v58 = vmul.f32 0.2, %v851_v54  ;;  %v855_v59 = vadd.f32 %v854_v57, %v649_v51  ;;  %v856_v60 = vpop.f32.mrb[7].mxu0  ;;  %vm859_vm9 = vcmp.gt.f32.partialorder %v851_v54, 0.0  ;;  %v2178_v57 = vld [vmem:[#allocation2 + $0x4f0] ss:$8 sps:$4 sm:$0xff]  }
 0x2c8   : > { %v864_v61 = vmul.f32 0.2, %v853_v56  ;;  %v857_v62 = vadd.f32 %v856_v60, %v653_v52  ;;  %vm860_vm10 = vcmp.gt.f32.partialorder %v853_v56, 0.0 }
 0x2c9   : > { %vm861_vm11 = vcmp.gt.f32.partialorder %v855_v59, 0.0  ;;  %v865_v63 = vmul.f32 0.2, %v855_v59  ;;  %v867_v1 = vsel %vm859_vm9, %v851_v54, %v863_v58  ;;  %v2177_v54 = vld [vmem:[#allocation2 + $0x4e4] ss:$8 sps:$4 sm:$0xff]  }
 0x2ca   : > { %vm862_vm12 = vcmp.gt.f32.partialorder %v857_v62, 0.0  ;;  %v866_v0 = vmul.f32 0.2, %v857_v62  ;;  %v868_v6 = vsel %vm860_vm10, %v853_v56, %v864_v61  ;;  %v2180_v56 = vld [vmem:[#allocation2 + $0x4f4] ss:$8 sps:$4 sm:$0xff]  }
 0x2cb   : > { %v869_v3 = vsel %vm861_vm11, %v855_v59, %v865_v63  ;;  %v1844_v58 = vld [vmem:[%s2376_s4 + $0x4] ss:$8 sm:$0x3] }
 0x2cc   : > { %v871_v5 = vpack.c.bf16 %v869_v3, %v867_v1  ;;  %v870_v7 = vsel %vm862_vm12, %v857_v62, %v866_v0  ;;  %v1163_v59 = vrot.slane %v1844_v58, %v2323_v2  ;;  %v1167_v60 = vrot.slane %v1844_v58, %v2328_v4 }
 0x2cd   : > { %v872_v8 = vpack.c.bf16 %v870_v7, %v868_v6 }
 0x2cf   : > { %1111 = vmatprep.mubr.bf16.mxu1 %v872_v8 }
 0x2d0   : > { %1112 = vmatmul.mubr.bf16.vlgmr.msra.gmra.mrb[4].mxu1 %v871_v5 }
 0x2d1   : > { %1586 = vmatpush1.bf16.msra.mxu1 %v2133_v13  ;;  %v1877_v13 = vld [vmem:[%s2376_s4 + $0x5] ss:$8 sm:$0x3] }
 0x2d2   : > { %1587 = vmatprep.subr.bf16.mxu1 %v2138_v15  ;;  %v1418_v14 = vrot.slane %v1877_v13, %v2323_v2  ;;  %v1422_v15 = vrot.slane %v1877_v13, %v2328_v4 }
 0x2d5   : > { %1588 = vmatpush1.bf16.msra.mxu1 %v2136_v16  ;;  %v1632_v16 = vld [vmem:[%s2375_s3] sm:$0x3] }
 0x2d6   : > { %1589 = vmatprep.subr.bf16.mxu1 %v2141_v17 }
 0x2d9   : > { %1590 = vmatpush1.bf16.msra.mxu1 %v2139_v18 }
 0x2da   : > { %1591 = vmatprep.subr.bf16.mxu1 %v2144_v19 }
 0x2dd   : > { %1592 = vmatpush1.bf16.msra.mxu1 %v2142_v20  ;;  %v1637_v20 = vrot.slane %v1632_v16, %v2323_v2  ;;  %v1654_v2 = vld [vmem:[%s2376_s4 + $0x6] ss:$0 sm:$0xff] }
 0x2de   : > { %1593 = vmatprep.subr.bf16.mxu1 %v2147_v21 }
 0x2e1   : > { %1594 = vmatpush1.bf16.msra.mxu1 %v2145_v22 }
 0x2e2   : > { %1595 = vmatprep.subr.bf16.mxu1 %v2150_v23  ;;  %v1641_v23 = vrot.slane %v1632_v16, %v2328_v4 }
 0x2e5   : > { %1596 = vmatpush1.bf16.msra.mxu1 %v2148_v24 }
 0x2e6   : > { %1597 = vmatprep.subr.bf16.mxu1 %v2153_v25 }
 0x2e9   : > { %1598 = vmatpush1.bf16.msra.mxu1 %v2151_v26 }
 0x2ea   : > { %1599 = vmatprep.subr.bf16.mxu1 %v2156_v27 }
 0x2ed   : > { %1600 = vmatpush1.bf16.msra.mxu1 %v2154_v28 }
 0x2ee   : > { %1601 = vmatprep.subr.bf16.mxu1 %v2159_v29 }
 0x2f1   : > { %1602 = vmatpush1.bf16.msra.mxu1 %v2157_v30 }
 0x2f2   : > { %1603 = vmatprep.subr.bf16.mxu1 %v2162_v31 }
 0x2f5   : > { %1604 = vmatpush1.bf16.msra.mxu1 %v2160_v32 }
 0x2f6   : > { %1605 = vmatprep.subr.bf16.mxu1 %v2165_v33 }
 0x2f9   : > { %1606 = vmatpush1.bf16.msra.mxu1 %v2163_v34 }
 0x2fa   : > { %1607 = vmatprep.subr.bf16.mxu1 %v2168_v35 }
 0x2fd   : > { %1608 = vmatpush1.bf16.msra.mxu1 %v2166_v36 }
 0x2fe   : > { %1609 = vmatprep.subr.bf16.mxu1 %v2171_v37 }
 0x301   : > { %1610 = vmatpush1.bf16.msra.mxu1 %v2169_v38 }
 0x302   : > { %1611 = vmatprep.subr.bf16.mxu1 %v2174_v39 }
 0x305   : > { %1612 = vmatpush1.bf16.msra.mxu1 %v2172_v40 }
 0x306   : > { %1613 = vmatprep.subr.bf16.mxu1 %v2177_v54 }
 0x309   : > { %1614 = vmatpush1.bf16.msra.mxu1 %v2175_v55 }
 0x30a   : > { %1615 = vmatprep.subr.bf16.mxu1 %v2180_v56 }
 0x30d   : > { %1616 = vmatpush1.bf16.msra.mxu1 %v2178_v57 }
 0x3a3   : > { %v1113_v43 = vpop.f32.mrb[4].mxu1 }
 0x3a4   : > { %v1115_v45 = vpop.f32.mrb[5].mxu1  ;;  %v1114_v47 = vadd.f32 %v1113_v43, %v912_v42 }
 0x3a5   : > { %v1117_v46 = vpop.f32.mrb[6].mxu1  ;;  %v1116_v50 = vadd.f32 %v1115_v45, %v916_v44 }
 0x3a6   : > { %v1118_v48 = vadd.f32 %v1117_v46, %v912_v42  ;;  %v1119_v49 = vpop.f32.mrb[7].mxu1 }
 0x3a7   : > { %v1120_v51 = vadd.f32 %v1119_v49, %v916_v44 }
 0x3a8   : > { %v1122_v52 = vpack.c.bf16 %v1118_v48, %v1114_v47 }
 0x3a9   : > { %v1123_v53 = vpack.c.bf16 %v1120_v51, %v1116_v50 }
 0x3ab   : > { %1362 = vmatprep.mubr.bf16.mxu0 %v1123_v53 }
 0x3ac   : > { %1363 = vmatmul.mubr.bf16.vlgmr.msra.gmra.mrb[8].mxu0 %v1122_v52 }
 0x47f   : > { %v1364_v61 = vpop.f32.mrb[8].mxu0 }
 0x480   : > { %v1365_v62 = vadd.f32 %v1364_v61, %v1163_v59  ;;  %v1366_v63 = vpop.f32.mrb[9].mxu0 }
 0x481   : > { %v1367_v0 = vadd.f32 %v1366_v63, %v1167_v60  ;;  %v1368_v1 = vpop.f32.mrb[10].mxu0 }
 0x482   : > { %v1369_v3 = vadd.f32 %v1368_v1, %v1163_v59  ;;  %v1370_v5 = vpop.f32.mrb[11].mxu0  ;;  %v1373_v7 = vmax.f32 %v1365_v62, 0.0 }
 0x483   : > { %v1371_v6 = vadd.f32 %v1370_v5, %v1167_v60  ;;  %v1374_v9 = vmax.f32 %v1367_v0, 0.0 }
 0x484   : > { %v1375_v8 = vmax.f32 %v1369_v3, 0.0 }
 0x485   : > { %v1376_v10 = vmax.f32 %v1371_v6, 0.0 }
 0x486   : > { %v1377_v11 = vpack.c.bf16 %v1375_v8, %v1373_v7 }
 0x487   : > { %v1378_v12 = vpack.c.bf16 %v1376_v10, %v1374_v9 }
 0x489   : > { %1617 = vmatprep.mubr.bf16.mxu1 %v1378_v12 }
 0x48a   : > { %1618 = vmatmul.mubr.bf16.vlgmr.msra.gmra.mrb[8].mxu1 %v1377_v11 }
 0x55d   : > { %v1619_v17 = vpop.f32.mrb[8].mxu1 }
 0x55e   : > { %v1620_v18 = vadd.f32 %v1619_v17, %v1418_v14  ;;  %v1621_v19 = vpop.f32.mrb[9].mxu1 }
 0x55f   : > { %v1622_v21 = vadd.f32 %v1621_v19, %v1422_v15  ;;  %v1623_v22 = vpop.f32.mrb[10].mxu1 }
 0x560   : > { %v1628_v24 = vmax.f32 %v1620_v18, 0.0  ;;  %v1624_v25 = vadd.f32 %v1623_v22, %v1418_v14  ;;  %v1625_v26 = vpop.f32.mrb[11].mxu1 }
 0x561   : > { %v1629_v27 = vmax.f32 %v1622_v21, 0.0  ;;  %v1626_v28 = vadd.f32 %v1625_v26, %v1422_v15 }
 0x562   : > { %v1630_v29 = vmax.f32 %v1624_v25, 0.0  ;;  %v1644_v30 = vmul.f32 %v1637_v20, %v1628_v24 }
 0x563   : > { %v1631_v31 = vmax.f32 %v1626_v28, 0.0  ;;  %v1645_v32 = vmul.f32 %v1641_v23, %v1629_v27 }
 0x564   : > { %v1646_v33 = vmul.f32 %v1637_v20, %v1630_v29 }
 0x565   : > { %v1647_v34 = vmul.f32 %v1641_v23, %v1631_v31  ;;  %v1648_v35 = vadd.f32 %v1645_v32, %v1644_v30 }
 0x567   : > { %1649 = vadd.xlane.f32.xlu0 %v1648_v35  ;;  %v1651_v36 = vadd.f32 %v1647_v34, %v1646_v33 }
 0x56b   : > { %1652 = vadd.xlane.f32.xlu0 %v1651_v36 }
 0x5f4   : > { %v1650_v4 = vpop.xlane.xlu0 %1649 }
 0x5f5   : > { %v1655_v37 = vadd.f32 %v1654_v2, %v1650_v4 }
 0x5f7   : > { %1658 = vst.msk [vmem:[%s241_s19] sm:$0xff] %vm1657_vm13, %v1655_v37 }
 0x5f8   : > { %v1653_v38 = vpop.xlane.xlu0 %1652 }
 0x5f9   : > { %v1656_v39 = vadd.f32 %v1654_v2, %v1653_v38 }
 0x5fb   : > { %1659 = vst.msk [vmem:[%s241_s19 + $0x8] sm:$0xff] %vm1657_vm13, %v1656_v39 }
 0x5fc PF: > { %s16_s18 = sadd.s32 1, %s2219_s18  }
 0x5fd   : > { %p13_p3 = scmp.ge.s32.totalorder %s16_s18, 5  }
 0x5ff   :  { %15 = sbr.rel (!%p13_p3) target bundleno = 1 (0x1), region = 84 }
 0x606   :  { %1682 = vsyncpa [#allocation3], 1 }
 0x607   :  { %1684 = vsyncpa [#allocation3 + $0x1], 1 }

</bundles_post_ra>
